<compile_context>
chip_gen: v7x
topology: tpu7x:2x2x1
jax: 0.10.0
libtpu: 0.0.40
codegen_flags: <defaults>
</compile_context>

<pallas_src>
import functools

import jax
import jax.numpy as jnp
from jax.experimental import pallas as pl
from jax.experimental.pallas import tpu as pltpu


def _round_up(x, m):
    return (x + m - 1) // m * m


def mlp_kernel(x_ref, w1_ref, b1_ref, w2_ref, b2_ref, w3_ref, b3_ref, out_ref):
    # fc1: bf16 x bf16 on the MXU, f32 accumulate; bias + ReLU in f32 (VPU).
    h1 = jnp.dot(x_ref[...], w1_ref[...], preferred_element_type=jnp.float32)
    h1 = jnp.maximum(h1 + b1_ref[...], 0.0)
    # fc2 + ReLU: activation stays in f32 (matches the f32 PyTorch model);
    # the weight is bf16 in HBM/VMEM and only widened for the dot.
    h2 = jnp.dot(h1, w2_ref[...].astype(jnp.float32),
                 preferred_element_type=jnp.float32)
    h2 = jnp.maximum(h2 + b2_ref[...], 0.0)
    # fc3 (no activation); output block is lane-padded to 128 for dense stores.
    o = jnp.dot(h2, w3_ref[...].astype(jnp.float32),
                preferred_element_type=jnp.float32) + b3_ref[...]
    out_ref[...] = o.astype(out_ref.dtype)


def prepare_params(params, *, lane=128):
    """One-time weight prep (hoisted out of the per-call path): bf16 weights,
    f32 biases, fc3 lane-padded to a multiple of 128 for dense stores."""
    w1, b1, w2, b2, w3, b3 = params
    out_dim = w3.shape[1]
    o_pad = _round_up(out_dim, lane)
    if o_pad != out_dim:
        w3 = jnp.pad(w3, ((0, 0), (0, o_pad - out_dim)))
        b3 = jnp.pad(b3, ((0, 0), (0, o_pad - out_dim)))
    prepped = (w1.astype(jnp.bfloat16), b1.astype(jnp.float32),
               w2.astype(jnp.bfloat16), b2.astype(jnp.float32),
               w3.astype(jnp.bfloat16), b3.astype(jnp.float32))
    return prepped, out_dim


def _pick_batch_tile(B, batch_tile):
    # Multiple of 16 (full bf16 sublane packing); default 256 fills the M dim
    # of the 256-wide v6e/v7x MXU (v5e's 128-wide MXU is saturated either way).
    TB = _round_up(min(batch_tile, _round_up(B, 16)), 16)
    # v7x megacore: prefer >= 2 grid steps whenever the batch allows it so the
    # "parallel" batch axis can shard across both TensorCores.
    if B >= 32 and _round_up(B, TB) // TB < 2:
        TB = _round_up(pl.cdiv(B, 2), 16)
    return TB


@functools.partial(jax.jit, static_argnames=("out_dim", "batch_tile"))
def mlp_forward(x_img, prepped_params, *, out_dim=4, batch_tile=256):
    """x_img: (B, C, H, W) float32.  Returns (B, out_dim) float32."""
    w1b, b1, w2b, b2, w3b, b3 = prepped_params
    B = x_img.shape[0]
    x = x_img.reshape(B, -1).astype(jnp.bfloat16)   # same flattening as torch .view
    D, H1 = w1b.shape
    H2 = w2b.shape[1]
    O_pad = w3b.shape[1]

    TB = _pick_batch_tile(B, batch_tile)
    B_pad = _round_up(B, TB)
    if B_pad != B:
        x = jnp.pad(x, ((0, B_pad - B), (0, 0)))
    n_tiles = B_pad // TB

    flops = 2 * B_pad * (D * H1 + H1 * H2 + H2 * O_pad)
    bytes_accessed = (
        x.size * 2 + w1b.size * 2 + w2b.size * 2 + w3b.size * 2
        + b1.size * 4 + b2.size * 4 + b3.size * 4 + B_pad * O_pad * 4)

    # VMEM budget: double-buffered weights/biases (constant index_map, still
    # 2-deep by default) + double-buffered x/out tiles, with 2x headroom,
    # clamped to the 64 MiB v7x per-TensorCore physical ceiling.
    vmem_bytes = (
        4 * (w1b.size + w2b.size + w3b.size)        # 2 bufs x bf16 weights
        + 8 * (b1.size + b2.size + b3.size)         # 2 bufs x f32 biases
        + 2 * (TB * D * 2 + TB * O_pad * 4))        # 2 bufs x (x bf16, out f32)
    vmem_limit = int(min(64 * 1024 * 1024, max(4 * 1024 * 1024, 2 * vmem_bytes)))

    # TODO(synk): when D/H1 grow into the thousands, mark the constant weight
    # BlockSpecs pipeline_mode=pl.Buffered(1) and add a K-reduction grid axis
    # as the LAST grid dim ("arbitrary", f32 VMEM accumulator + pl.when
    # init/finalize) so resident fc1 weights stay bounded under v7x's 64 MiB.
    out_pad = pl.pallas_call(
        mlp_kernel,
        out_shape=jax.ShapeDtypeStruct((B_pad, O_pad), jnp.float32),
        grid_spec=pl.GridSpec(
            grid=(n_tiles,),
            in_specs=[
                pl.BlockSpec((TB, D), lambda i: (i, 0)),      # x tile (pipelined)
                pl.BlockSpec((D, H1), lambda i: (0, 0)),      # weights: VMEM-resident
                pl.BlockSpec((1, H1), lambda i: (0, 0)),
                pl.BlockSpec((H1, H2), lambda i: (0, 0)),
                pl.BlockSpec((1, H2), lambda i: (0, 0)),
                pl.BlockSpec((H2, O_pad), lambda i: (0, 0)),
                pl.BlockSpec((1, O_pad), lambda i: (0, 0)),
            ],
            out_specs=pl.BlockSpec((TB, O_pad), lambda i: (i, 0)),
        ),
        compiler_params=pltpu.CompilerParams(
            dimension_semantics=("parallel",),
            vmem_limit_bytes=vmem_limit),
        cost_estimate=pl.CostEstimate(
            flops=int(flops), transcendentals=0,
            bytes_accessed=int(bytes_accessed)),
    )(x, w1b, b1, w2b, b2, w3b, b3)

    return out_pad[:B, :out_dim]


def init_params(key, input_dim, hidden1, hidden2, out_dim=4):
    """Deterministic PyTorch-style (uniform +-1/sqrt(fan_in)) init.
    Weights are stored as (in, out) == torch weight transposed."""
    ks = jax.random.split(key, 6)

    def lin(kw, kb, fan_in, fan_out):
        bound = 1.0 / jnp.sqrt(fan_in)
        w = jax.random.uniform(kw, (fan_in, fan_out), jnp.float32, -bound, bound)
        b = jax.random.uniform(kb, (1, fan_out), jnp.float32, -bound, bound)
        return w, b

    w1, b1 = lin(ks[0], ks[1], input_dim, hidden1)
    w2, b2 = lin(ks[2], ks[3], hidden1, hidden2)
    w3, b3 = lin(ks[4], ks[5], hidden2, out_dim)
    return (w1, b1, w2, b2, w3, b3)


def mlp_reference(x_img, params):
    """Pure-JAX reference: bf16-quantized weights/input, f32 activations/math
    (mirrors the kernel numerics; matches the PyTorch f32 model up to bf16
    weight rounding)."""
    w1, b1, w2, b2, w3, b3 = params
    bf = lambda a: a.astype(jnp.bfloat16).astype(jnp.float32)
    x = bf(x_img.reshape(x_img.shape[0], -1))
    h1 = jnp.maximum(x @ bf(w1) + b1, 0.0)
    h2 = jnp.maximum(h1 @ bf(w2) + b2, 0.0)
    return h2 @ bf(w3) + b3


if __name__ == "__main__":
    # Small shapes consistent with the module's forward:
    # image (B, 3, 16, 16) -> flattened dim 768 -> hidden1=256 -> hidden2=128 -> 4
    B, C, H, W = 2, 3, 16, 16
    input_dim = C * H * W
    hidden1, hidden2 = 256, 128

    key = jax.random.PRNGKey(0)
    k_x, k_p = jax.random.split(key)
    x_img = jax.random.normal(k_x, (B, C, H, W), jnp.float32)
    params = init_params(k_p, input_dim, hidden1, hidden2)

    # One-time weight prep (bf16 cast + fc3 lane-padding), hoisted out of the
    # per-call path so repeated forwards never re-materialize weights.
    prepped, out_dim = prepare_params(params)

    out = mlp_forward(x_img, prepped, out_dim=out_dim, batch_tile=256)
    out = jax.block_until_ready(out)

    ref = mlp_reference(x_img, params)
    assert out.shape == (B, out_dim), out.shape
    assert jnp.allclose(out, ref, atol=5e-3, rtol=5e-3), "mismatch vs reference"

    print("KERNEL_OK")
</pallas_src>

<mosaic_0001>
module attributes {stable_mosaic.version = 11 : i64} {
  func.func @mlp_kernel(%arg0: i32, %arg1: memref<16x768xbf16, #tpu.memory_space<vmem>>, %arg2: memref<768x256xbf16, #tpu.memory_space<vmem>>, %arg3: memref<1x256xf32, #tpu.memory_space<vmem>>, %arg4: memref<256x128xbf16, #tpu.memory_space<vmem>>, %arg5: memref<1x128xf32, #tpu.memory_space<vmem>>, %arg6: memref<128x128xbf16, #tpu.memory_space<vmem>>, %arg7: memref<1x128xf32, #tpu.memory_space<vmem>>, %arg8: memref<16x128xf32, #tpu.memory_space<vmem>>) attributes {dimension_semantics = [#tpu.dimension_semantics<parallel>], iteration_bounds = array<i64: 1>, scalar_prefetch = 0 : i64, scratch_operands = 0 : i64, tpu.core_type = #tpu.core_type<tc>, window_params = [{transform_indices = @transform_0, window_bounds = array<i64: 16, 768>}, {pipeline_mode = #tpu.pipeline_mode<synchronous>, transform_indices = @transform_1, window_bounds = array<i64: 768, 256>}, {pipeline_mode = #tpu.pipeline_mode<synchronous>, transform_indices = @transform_2, window_bounds = array<i64: 1, 256>}, {pipeline_mode = #tpu.pipeline_mode<synchronous>, transform_indices = @transform_3, window_bounds = array<i64: 256, 128>}, {pipeline_mode = #tpu.pipeline_mode<synchronous>, transform_indices = @transform_4, window_bounds = array<i64: 1, 128>}, {pipeline_mode = #tpu.pipeline_mode<synchronous>, transform_indices = @transform_5, window_bounds = array<i64: 128, 128>}, {pipeline_mode = #tpu.pipeline_mode<synchronous>, transform_indices = @transform_6, window_bounds = array<i64: 1, 128>}, {transform_indices = @transform_7, window_bounds = array<i64: 16, 128>}]} {
    %c0 = arith.constant 0 : index
    %c0_0 = arith.constant 0 : index
    %0 = vector.load %arg1[%c0, %c0_0] : memref<16x768xbf16, #tpu.memory_space<vmem>>, vector<16x768xbf16>
    %c0_1 = arith.constant 0 : index
    %c0_2 = arith.constant 0 : index
    %1 = vector.load %arg2[%c0_1, %c0_2] : memref<768x256xbf16, #tpu.memory_space<vmem>>, vector<768x256xbf16>
    %cst = arith.constant dense<0.000000e+00> : vector<16x256xf32>
    %2 = tpu.matmul %0, %1, %cst {dimension_numbers = #tpu.dot_dimension_numbers<[1], [0], [0], [1], [0, 0, 1, 1], [], []>} : vector<16x768xbf16>, vector<768x256xbf16>, vector<16x256xf32> -> vector<16x256xf32>
    %c0_3 = arith.constant 0 : index
    %c0_4 = arith.constant 0 : index
    %3 = vector.load %arg3[%c0_3, %c0_4] : memref<1x256xf32, #tpu.memory_space<vmem>>, vector<1x256xf32>
    %4 = vector.broadcast %3 : vector<1x256xf32> to vector<16x256xf32>
    %5 = arith.addf %2, %4 : vector<16x256xf32>
    %cst_5 = arith.constant 0.000000e+00 : f32
    %6 = vector.broadcast %cst_5 : f32 to vector<16x256xf32>
    %7 = arith.maximumf %5, %6 : vector<16x256xf32>
    %c0_6 = arith.constant 0 : index
    %c0_7 = arith.constant 0 : index
    %8 = vector.load %arg4[%c0_6, %c0_7] : memref<256x128xbf16, #tpu.memory_space<vmem>>, vector<256x128xbf16>
    %9 = arith.extf %8 : vector<256x128xbf16> to vector<256x128xf32>
    %cst_8 = arith.constant dense<0.000000e+00> : vector<16x128xf32>
    %10 = tpu.matmul %7, %9, %cst_8 {dimension_numbers = #tpu.dot_dimension_numbers<[1], [0], [0], [1], [0, 0, 1, 1], [], []>} : vector<16x256xf32>, vector<256x128xf32>, vector<16x128xf32> -> vector<16x128xf32>
    %c0_9 = arith.constant 0 : index
    %c0_10 = arith.constant 0 : index
    %11 = vector.load %arg5[%c0_9, %c0_10] : memref<1x128xf32, #tpu.memory_space<vmem>>, vector<1x128xf32>
    %12 = vector.broadcast %11 : vector<1x128xf32> to vector<16x128xf32>
    %13 = arith.addf %10, %12 : vector<16x128xf32>
    %cst_11 = arith.constant 0.000000e+00 : f32
    %14 = vector.broadcast %cst_11 : f32 to vector<16x128xf32>
    %15 = arith.maximumf %13, %14 : vector<16x128xf32>
    %c0_12 = arith.constant 0 : index
    %c0_13 = arith.constant 0 : index
    %16 = vector.load %arg6[%c0_12, %c0_13] : memref<128x128xbf16, #tpu.memory_space<vmem>>, vector<128x128xbf16>
    %17 = arith.extf %16 : vector<128x128xbf16> to vector<128x128xf32>
    %cst_14 = arith.constant dense<0.000000e+00> : vector<16x128xf32>
    %18 = tpu.matmul %15, %17, %cst_14 {dimension_numbers = #tpu.dot_dimension_numbers<[1], [0], [0], [1], [0, 0, 1, 1], [], []>} : vector<16x128xf32>, vector<128x128xf32>, vector<16x128xf32> -> vector<16x128xf32>
    %c0_15 = arith.constant 0 : index
    %c0_16 = arith.constant 0 : index
    %19 = vector.load %arg7[%c0_15, %c0_16] : memref<1x128xf32, #tpu.memory_space<vmem>>, vector<1x128xf32>
    %20 = vector.broadcast %19 : vector<1x128xf32> to vector<16x128xf32>
    %21 = arith.addf %18, %20 : vector<16x128xf32>
    %c0_17 = arith.constant 0 : index
    %c0_18 = arith.constant 0 : index
    %22 = vector.load %arg8[%c0_17, %c0_18] : memref<16x128xf32, #tpu.memory_space<vmem>>, vector<16x128xf32>
    tpu.vector_store %arg8[%c0_17, %c0_18], %21 {strides = array<i32>} : memref<16x128xf32, #tpu.memory_space<vmem>>, vector<16x128xf32>,
    return
  }
  func.func @transform_0(%arg0: i32) -> (i32, i32) {
    %c0_i32 = arith.constant 0 : i32
    %c0_i32_0 = arith.constant 0 : i32
    return %arg0, %c0_i32 : i32, i32
  }
  func.func @transform_1(%arg0: i32) -> (i32, i32) {
    %c0_i32 = arith.constant 0 : i32
    %c0_i32_0 = arith.constant 0 : i32
    %c0_i32_1 = arith.constant 0 : i32
    return %c0_i32, %c0_i32_0 : i32, i32
  }
  func.func @transform_2(%arg0: i32) -> (i32, i32) {
    %c0_i32 = arith.constant 0 : i32
    %c0_i32_0 = arith.constant 0 : i32
    %c0_i32_1 = arith.constant 0 : i32
    return %c0_i32, %c0_i32_0 : i32, i32
  }
  func.func @transform_3(%arg0: i32) -> (i32, i32) {
    %c0_i32 = arith.constant 0 : i32
    %c0_i32_0 = arith.constant 0 : i32
    %c0_i32_1 = arith.constant 0 : i32
    return %c0_i32, %c0_i32_0 : i32, i32
  }
  func.func @transform_4(%arg0: i32) -> (i32, i32) {
    %c0_i32 = arith.constant 0 : i32
    %c0_i32_0 = arith.constant 0 : i32
    %c0_i32_1 = arith.constant 0 : i32
    return %c0_i32, %c0_i32_0 : i32, i32
  }
  func.func @transform_5(%arg0: i32) -> (i32, i32) {
    %c0_i32 = arith.constant 0 : i32
    %c0_i32_0 = arith.constant 0 : i32
    %c0_i32_1 = arith.constant 0 : i32
    return %c0_i32, %c0_i32_0 : i32, i32
  }
  func.func @transform_6(%arg0: i32) -> (i32, i32) {
    %c0_i32 = arith.constant 0 : i32
    %c0_i32_0 = arith.constant 0 : i32
    %c0_i32_1 = arith.constant 0 : i32
    return %c0_i32, %c0_i32_0 : i32, i32
  }
  func.func @transform_7(%arg0: i32) -> (i32, i32) {
    %c0_i32 = arith.constant 0 : i32
    %c0_i32_0 = arith.constant 0 : i32
    return %arg0, %c0_i32 : i32, i32
  }
}

</mosaic_0001>

<bundles_post_ra>
// kernel: mlp_forward.1
= control target key start
LH: loop header
LB: loop body
LE: loop exit
PB: predicated region body
PF: predicated region fallthrough
CT: control target
= control target key end

     0   :  { %12 = vsyncpa [#allocation3], 0  ;;  %s1635_s24 = smov [#allocation2]   ;;  %s1795_s0 = inlined_call_operand.vmem [shape: bf16[16,768], index: 0, kind: input, shape index: {}]   ;;  %s1796_s1 = inlined_call_operand.hbm [shape: bf16[768,256], index: 1, kind: input, shape index: {}]   ;;  %s1797_s2 = inlined_call_operand.vmem [shape: f32[1,256], index: 2, kind: input, shape index: {}]   ;;  %s1798_s3 = inlined_call_operand.vmem [shape: bf16[256,128], index: 3, kind: input, shape index: {}]   ;;  %s1799_s4 = inlined_call_operand.vmem [shape: f32[1,128], index: 4, kind: input, shape index: {}]   ;;  %s1800_s5 = inlined_call_operand.vmem [shape: bf16[128,128], index: 5, kind: input, shape index: {}]   ;;  %s1801_s6 = inlined_call_operand.vmem [shape: f32[1,128], index: 6, kind: input, shape index: {}]   ;;  %s1802_s7 = inlined_call_operand.vmem [shape: f32[16,128], index: 7, kind: output, shape index: {}]  }
   0x1   :  { %s20_s25 = sshll.u32 %s1635_s24, 4  ;;  %s1611_s28 = scalar_lea.hbm %s1796_s1, 12288  ;;  %s21_s25 = int_to_ptr.vmem [resolvable:$true] %s20_s25 }
   0x2   :  { %p1612_p0 = scmp.ne.s32.totalorder %s1796_s1, %s1611_s28  ;;  %p1615_p1 = scmp.lt.u32.totalorder %s1611_s28, %s1796_s1 }
   0x4   :  { %p1617_p2 = pnand %p1615_p1, %p1612_p0 }
   0x6   :  { %1620 = shalt.err (!%p1617_p2)
}
   0x7   :  { %s1621_s10 = scalar_lea.vmem %s21_s25, 12288  ;;  %p1626_p4 = scmp.lt.s32.totalorder %s21_s25, %s21_s25 }
   0x8   :  { %p1622_p3 = scmp.ne.s32.totalorder %s21_s25, %s1621_s10  ;;  %p1627_p5 = scmp.lt.s32.totalorder %s1621_s10, %s1621_s10 }
   0xa   :  { %p1628_p6 = por %p1627_p5, %p1626_p4 }
   0xc   :  { %p1629_p7 = pnand %p1628_p6, %p1622_p3 }
   0xe   :  { %1632 = shalt.err (!%p1629_p7)
}
   0xf   :  { %s1636_s11 = smov 128   ;;  %s1637_s12 = smov 8  }
  0x10   :  { %26 = dma.hbm_to_vmem [thread:$0]  %s1796_s1, 12288, %s21_s25, [#allocation3], %s1636_s11, %s1636_s11, %s1637_s12  }
  0x11   :  { %1633 = dma.done.wait [#allocation3], 12288  }
  0x12   :  { %1634 = vsyncadd [#allocation3], 4294955008  ;;  %v1458_v0 = vld [vmem:[#allocation2 + $0x104] ss:$8 sps:$4 sm:$0xff]   ;;  %v1460_v1 = vld [vmem:[#allocation2 + $0x100] ss:$8 sps:$4 sm:$0xff]  }
  0x13   :  { %707 = vmatprep.subr.bf16.mxu0 %v1458_v0  ;;  %v1461_v2 = vld [vmem:[#allocation2 + $0x114] ss:$8 sps:$4 sm:$0xff]   ;;  %v1463_v3 = vld [vmem:[#allocation2 + $0x110] ss:$8 sps:$4 sm:$0xff]   ;;  %v1464_v4 = vld [vmem:[#allocation2 + $0x124] ss:$8 sps:$4 sm:$0xff]  }
  0x14   :  { %708 = vmatpush1.bf16.msra.mxu0 %v1460_v1  ;;  %v1466_v5 = vld [vmem:[#allocation2 + $0x120] ss:$8 sps:$4 sm:$0xff]   ;;  %v1467_v6 = vld [vmem:[#allocation2 + $0x134] ss:$8 sps:$4 sm:$0xff]   ;;  %v1469_v7 = vld [vmem:[#allocation2 + $0x130] ss:$8 sps:$4 sm:$0xff]  }
  0x15   :  { %709 = vmatprep.subr.bf16.mxu0 %v1461_v2  ;;  %v1470_v8 = vld [vmem:[#allocation2 + $0x144] ss:$8 sps:$4 sm:$0xff]   ;;  %v1472_v9 = vld [vmem:[#allocation2 + $0x140] ss:$8 sps:$4 sm:$0xff]   ;;  %v1473_v10 = vld [vmem:[#allocation2 + $0x154] ss:$8 sps:$4 sm:$0xff]  }
  0x16   :  { %v1475_v11 = vld [vmem:[#allocation2 + $0x150] ss:$8 sps:$4 sm:$0xff]   ;;  %v1476_v12 = vld [vmem:[#allocation2 + $0x164] ss:$8 sps:$4 sm:$0xff]   ;;  %v1505_v14 = vld [vmem:[#allocation2] ss:$8 sps:$4 sm:$0xff]  }
  0x17   :  { %v1503_v13 = vld [vmem:[#allocation2 + $0x4] ss:$8 sps:$4 sm:$0xff]   ;;  %v1478_v15 = vld [vmem:[#allocation2 + $0x160] ss:$8 sps:$4 sm:$0xff]   ;;  %v1509_v16 = vld [vmem:[#allocation2 + $0x14] ss:$8 sps:$4 sm:$0xff]  }
  0x18   :  { %710 = vmatpush1.bf16.msra.mxu0 %v1463_v3  ;;  %664 = vmatprep.subr.bf16.mxu1 %v1503_v13  ;;  %v1511_v17 = vld [vmem:[#allocation2 + $0x10] ss:$8 sps:$4 sm:$0xff]   ;;  %v1479_v18 = vld [vmem:[#allocation2 + $0x174] ss:$8 sps:$4 sm:$0xff]   ;;  %v1514_v19 = vld [vmem:[%s1795_s0 + $0xc] ss:$24 sps:$4 sm:$0xff]  }
  0x19   :  { %711 = vmatprep.subr.bf16.mxu0 %v1464_v4  ;;  %665 = vmatpush1.bf16.msra.mxu1 %v1505_v14  ;;  %v1481_v20 = vld [vmem:[#allocation2 + $0x170] ss:$8 sps:$4 sm:$0xff]   ;;  %v1518_v21 = vld [vmem:[#allocation2 + $0x24] ss:$8 sps:$4 sm:$0xff]   ;;  %v1520_v22 = vld [vmem:[#allocation2 + $0x20] ss:$8 sps:$4 sm:$0xff]  }
  0x1a   :  { %666 = vmatprep.subr.bf16.mxu1 %v1509_v16  ;;  %v1482_v23 = vld [vmem:[#allocation2 + $0x184] ss:$8 sps:$4 sm:$0xff]   ;;  %739 = vmatprep.mubr.bf16.mxu0 %v1514_v19  ;;  %v1484_v24 = vld [vmem:[#allocation2 + $0x180] ss:$8 sps:$4 sm:$0xff]   ;;  %v1524_v25 = vld [vmem:[#allocation2 + $0x34] ss:$8 sps:$4 sm:$0xff]  }
  0x1b   :  { %v1485_v26 = vld [vmem:[#allocation2 + $0x194] ss:$8 sps:$4 sm:$0xff]   ;;  %v1526_v27 = vld [vmem:[#allocation2 + $0x30] ss:$8 sps:$4 sm:$0xff]   ;;  %v1530_v28 = vld [vmem:[#allocation2 + $0x44] ss:$8 sps:$4 sm:$0xff]  }
  0x1c   :  { %712 = vmatpush1.bf16.msra.mxu0 %v1466_v5  ;;  %v1487_v29 = vld [vmem:[#allocation2 + $0x190] ss:$8 sps:$4 sm:$0xff]   ;;  %v1488_v30 = vld [vmem:[#allocation2 + $0x1a4] ss:$8 sps:$4 sm:$0xff]   ;;  %v1532_v31 = vld [vmem:[#allocation2 + $0x40] ss:$8 sps:$4 sm:$0xff]  }
  0x1d   :  { %713 = vmatprep.subr.bf16.mxu0 %v1467_v6  ;;  %667 = vmatpush1.bf16.msra.mxu1 %v1511_v17  ;;  %v1536_v32 = vld [vmem:[#allocation2 + $0x54] ss:$8 sps:$4 sm:$0xff]   ;;  %v1490_v33 = vld [vmem:[#allocation2 + $0x1a0] ss:$8 sps:$4 sm:$0xff]   ;;  %v1538_v35 = vld [vmem:[#allocation2 + $0x50] ss:$8 sps:$4 sm:$0xff]  }
  0x1e   :  { %668 = vmatprep.subr.bf16.mxu1 %v1518_v21  ;;  %v1491_v34 = vld [vmem:[#allocation2 + $0x1b4] ss:$8 sps:$4 sm:$0xff]   ;;  %v1542_v36 = vld [vmem:[#allocation2 + $0x64] ss:$8 sps:$4 sm:$0xff]   ;;  %v1493_v37 = vld [vmem:[#allocation2 + $0x1b0] ss:$8 sps:$4 sm:$0xff]  }
  0x1f   :  { %v1494_v38 = vld [vmem:[#allocation2 + $0x1c4] ss:$8 sps:$4 sm:$0xff]   ;;  %v1544_v39 = vld [vmem:[#allocation2 + $0x60] ss:$8 sps:$4 sm:$0xff]   ;;  %v1548_v40 = vld [vmem:[#allocation2 + $0x74] ss:$8 sps:$4 sm:$0xff]  }
  0x20   :  { %714 = vmatpush1.bf16.msra.mxu0 %v1469_v7  ;;  %v1496_v41 = vld [vmem:[#allocation2 + $0x1c0] ss:$8 sps:$4 sm:$0xff]   ;;  %v1497_v42 = vld [vmem:[#allocation2 + $0x1d4] ss:$8 sps:$4 sm:$0xff]   ;;  %v1550_v43 = vld [vmem:[#allocation2 + $0x70] ss:$8 sps:$4 sm:$0xff]  }
  0x21   :  { %715 = vmatprep.subr.bf16.mxu0 %v1470_v8  ;;  %669 = vmatpush1.bf16.msra.mxu1 %v1520_v22  ;;  %v1554_v44 = vld [vmem:[#allocation2 + $0x84] ss:$8 sps:$4 sm:$0xff]   ;;  %v1499_v45 = vld [vmem:[#allocation2 + $0x1d0] ss:$8 sps:$4 sm:$0xff]   ;;  %v1556_v47 = vld [vmem:[#allocation2 + $0x80] ss:$8 sps:$4 sm:$0xff]  }
  0x22   :  { %670 = vmatprep.subr.bf16.mxu1 %v1524_v25  ;;  %v1500_v46 = vld [vmem:[#allocation2 + $0x1e4] ss:$8 sps:$4 sm:$0xff]   ;;  %v1560_v48 = vld [vmem:[#allocation2 + $0x94] ss:$8 sps:$4 sm:$0xff]   ;;  %v1502_v49 = vld [vmem:[#allocation2 + $0x1e0] ss:$8 sps:$4 sm:$0xff]  }
  0x23   :  { %v1506_v50 = vld [vmem:[#allocation2 + $0x1f4] ss:$8 sps:$4 sm:$0xff]   ;;  %v1562_v51 = vld [vmem:[#allocation2 + $0x90] ss:$8 sps:$4 sm:$0xff]   ;;  %v1566_v52 = vld [vmem:[#allocation2 + $0xa4] ss:$8 sps:$4 sm:$0xff]  }
  0x24   :  { %716 = vmatpush1.bf16.msra.mxu0 %v1472_v9  ;;  %v1508_v53 = vld [vmem:[#allocation2 + $0x1f0] ss:$8 sps:$4 sm:$0xff]   ;;  %v1517_v54 = vld [vmem:[#allocation2 + $0x204] ss:$8 sps:$4 sm:$0xff]   ;;  %v1568_v55 = vld [vmem:[#allocation2 + $0xa0] ss:$8 sps:$4 sm:$0xff]  }
  0x25   :  { %717 = vmatprep.subr.bf16.mxu0 %v1473_v10  ;;  %671 = vmatpush1.bf16.msra.mxu1 %v1526_v27  ;;  %v1572_v56 = vld [vmem:[#allocation2 + $0xb4] ss:$8 sps:$4 sm:$0xff]   ;;  %v1512_v57 = vld [vmem:[%s1795_s0 + $0x8] ss:$24 sps:$4 sm:$0xff]   ;;  %v1574_v60 = vld [vmem:[#allocation2 + $0xb0] ss:$8 sps:$4 sm:$0xff]  }
  0x26   :  { %672 = vmatprep.subr.bf16.mxu1 %v1530_v28  ;;  %v1515_v58 = vld [vmem:[#allocation2 + $0x200] ss:$8 sps:$4 sm:$0xff]   ;;  %v1523_v59 = vld [vmem:[#allocation2 + $0x214] ss:$8 sps:$4 sm:$0xff]   ;;  %v1578_v61 = vld [vmem:[#allocation2 + $0xc4] ss:$8 sps:$4 sm:$0xff]  }
  0x27   :  { %v1604_v62 = vld [vmem:[%s1795_s0 + $0x4] ss:$24 sps:$4 sm:$0xff]   ;;  %v1521_v63 = vld [vmem:[#allocation2 + $0x210] ss:$8 sps:$4 sm:$0xff]   ;;  %v1580_v0 = vld [vmem:[#allocation2 + $0xc0] ss:$8 sps:$4 sm:$0xff]  }
  0x28   :  { %718 = vmatpush1.bf16.msra.mxu0 %v1475_v11  ;;  %v1610_v1 = vld [vmem:[%s1795_s0 + $0x14] ss:$24 sps:$4 sm:$0xff]   ;;  %696 = vmatprep.mubr.bf16.mxu1 %v1604_v62  ;;  %v1527_v4 = vld [vmem:[#allocation2 + $0x220] ss:$8 sps:$4 sm:$0xff]   ;;  %v1586_v5 = vld [vmem:[#allocation2 + $0xd0] ss:$8 sps:$4 sm:$0xff]  }
  0x29   :  { %719 = vmatprep.subr.bf16.mxu0 %v1476_v12  ;;  %673 = vmatpush1.bf16.msra.mxu1 %v1532_v31  ;;  %v1529_v2 = vld [vmem:[#allocation2 + $0x224] ss:$8 sps:$4 sm:$0xff]   ;;  %v1584_v3 = vld [vmem:[#allocation2 + $0xd4] ss:$8 sps:$4 sm:$0xff]   ;;  %v1533_v8 = vld [vmem:[#allocation2 + $0x230] ss:$8 sps:$4 sm:$0xff]  }
  0x2a   :  { %674 = vmatprep.subr.bf16.mxu1 %v1536_v32  ;;  %v1535_v6 = vld [vmem:[#allocation2 + $0x234] ss:$8 sps:$4 sm:$0xff]   ;;  %v1590_v7 = vld [vmem:[#allocation2 + $0xe4] ss:$8 sps:$4 sm:$0xff]   ;;  %v1592_v9 = vld [vmem:[#allocation2 + $0xe0] ss:$8 sps:$4 sm:$0xff]  }
  0x2b   :  { %v1541_v10 = vld [vmem:[#allocation2 + $0x244] ss:$8 sps:$4 sm:$0xff]   ;;  %v1596_v11 = vld [vmem:[#allocation2 + $0xf4] ss:$8 sps:$4 sm:$0xff]   ;;  %v1539_v12 = vld [vmem:[#allocation2 + $0x240] ss:$8 sps:$4 sm:$0xff]  }
  0x2c   :  { %720 = vmatpush1.bf16.msra.mxu0 %v1478_v15  ;;  %v1598_v13 = vld [vmem:[#allocation2 + $0xf0] ss:$8 sps:$4 sm:$0xff]   ;;  %v1547_v14 = vld [vmem:[#allocation2 + $0x254] ss:$8 sps:$4 sm:$0xff]   ;;  %v1273_v15 = vld [vmem:[%s1798_s3 + $0x40] sm:$0xff]  }
  0x2d   :  { %721 = vmatprep.subr.bf16.mxu0 %v1479_v18  ;;  %675 = vmatpush1.bf16.msra.mxu1 %v1538_v35  ;;  %v1602_v16 = vld [vmem:[%s1795_s0] ss:$24 sps:$4 sm:$0xff]   ;;  %v1553_v18 = vld [vmem:[#allocation2 + $0x264] ss:$8 sps:$4 sm:$0xff]   ;;  %v1559_v22 = vld [vmem:[#allocation2 + $0x274] ss:$8 sps:$4 sm:$0xff]  }
  0x2e   :  { %676 = vmatprep.subr.bf16.mxu1 %v1542_v36  ;;  %v1545_v17 = vld [vmem:[#allocation2 + $0x250] ss:$8 sps:$4 sm:$0xff]   ;;  %v1171_v19 = vld [vmem:[%s1798_s3] sm:$0xff]  }
  0x2f   :  { %v1551_v21 = vld [vmem:[#allocation2 + $0x260] ss:$8 sps:$4 sm:$0xff]   ;;  %v1557_v25 = vld [vmem:[#allocation2 + $0x270] ss:$8 sps:$4 sm:$0xff]  }
  0x30   :  { %722 = vmatpush1.bf16.msra.mxu0 %v1481_v20  ;;  %v1274_v20 = vld [vmem:[%s1798_s3 + $0x48] sm:$0xff]   ;;  %v1267_v27 = vld [vmem:[%s1798_s3 + $0x10] sm:$0xff]   ;;  %v1276_v28 = vld [vmem:[%s1798_s3 + $0x58] sm:$0xff]  }
  0x31   :  { %723 = vmatprep.subr.bf16.mxu0 %v1482_v23  ;;  %677 = vmatpush1.bf16.msra.mxu1 %v1544_v39  ;;  %v1266_v23 = vld [vmem:[%s1798_s3 + $0x8] sm:$0xff]   ;;  %v1268_v31 = vld [vmem:[%s1798_s3 + $0x18] sm:$0xff]   ;;  %v1277_v32 = vld [vmem:[%s1798_s3 + $0x60] sm:$0xff]  }
  0x32   :  { %678 = vmatprep.subr.bf16.mxu1 %v1548_v40  ;;  %v1269_v35 = vld [vmem:[%s1798_s3 + $0x20] sm:$0xff]  }
  0x33   :  { %v1575_v36 = vld [vmem:[#allocation2 + $0x2a0] ss:$8 sps:$4 sm:$0xff]   ;;  %v1589_v39 = vld [vmem:[#allocation2 + $0x2c4] ss:$8 sps:$4 sm:$0xff]  }
  0x34   :  { %724 = vmatpush1.bf16.msra.mxu0 %v1484_v24  ;;  %v1275_v24 = vld [vmem:[%s1798_s3 + $0x50] sm:$0xff]   ;;  %v1587_v40 = vld [vmem:[#allocation2 + $0x2c0] ss:$8 sps:$4 sm:$0xff]  }
  0x35   :  { %725 = vmatprep.subr.bf16.mxu0 %v1485_v26  ;;  %679 = vmatpush1.bf16.msra.mxu1 %v1550_v43  ;;  %v1565_v26 = vld [vmem:[#allocation2 + $0x284] ss:$8 sps:$4 sm:$0xff]   ;;  %v142_v62 = vld [vmem:[%s1797_s2] sm:$0x3] }
  0x36   :  { %680 = vmatprep.subr.bf16.mxu1 %v1554_v44  ;;  %v1601_v43 = vld [vmem:[#allocation2 + $0x2e4] ss:$8 sps:$4 sm:$0xff]   ;;  %v1599_v44 = vld [vmem:[#allocation2 + $0x2e0] ss:$8 sps:$4 sm:$0xff]  }
  0x38   :  { %726 = vmatpush1.bf16.msra.mxu0 %v1487_v29  ;;  %v1563_v29 = vld [vmem:[#allocation2 + $0x280] ss:$8 sps:$4 sm:$0xff]  }
  0x39   :  { %727 = vmatprep.subr.bf16.mxu0 %v1488_v30  ;;  %681 = vmatpush1.bf16.msra.mxu1 %v1556_v47  ;;  %v1571_v30 = vld [vmem:[#allocation2 + $0x294] ss:$8 sps:$4 sm:$0xff]   ;;  %v1608_v47 = vld [vmem:[%s1795_s0 + $0x10] ss:$24 sps:$4 sm:$0xff]  }
  0x3a   :  { %682 = vmatprep.subr.bf16.mxu1 %v1560_v48  ;;  %v1278_v48 = vld [vmem:[%s1798_s3 + $0x68] sm:$0xff]  }
  0x3c   :  { %728 = vmatpush1.bf16.msra.mxu0 %v1490_v33  ;;  %v1569_v33 = vld [vmem:[#allocation2 + $0x290] ss:$8 sps:$4 sm:$0xff]  }
  0x3d   :  { %729 = vmatprep.subr.bf16.mxu0 %v1491_v34  ;;  %683 = vmatpush1.bf16.msra.mxu1 %v1562_v51  ;;  %v1577_v34 = vld [vmem:[#allocation2 + $0x2a4] ss:$8 sps:$4 sm:$0xff]   ;;  %v1271_v51 = vld [vmem:[%s1798_s3 + $0x30] sm:$0xff]  }
  0x3e   :  { %684 = vmatprep.subr.bf16.mxu1 %v1566_v52  ;;  %v1280_v52 = vld [vmem:[%s1798_s3 + $0x78] sm:$0xff]  }
  0x40   :  { %730 = vmatpush1.bf16.msra.mxu0 %v1493_v37  ;;  %v1583_v37 = vld [vmem:[#allocation2 + $0x2b4] ss:$8 sps:$4 sm:$0xff]  }
  0x41   :  { %731 = vmatprep.subr.bf16.mxu0 %v1494_v38  ;;  %685 = vmatpush1.bf16.msra.mxu1 %v1568_v55  ;;  %v1581_v38 = vld [vmem:[#allocation2 + $0x2b0] ss:$8 sps:$4 sm:$0xff]  }
  0x42   :  { %686 = vmatprep.subr.bf16.mxu1 %v1572_v56 }
  0x44   :  { %732 = vmatpush1.bf16.msra.mxu0 %v1496_v41  ;;  %v1595_v41 = vld [vmem:[#allocation2 + $0x2d4] ss:$8 sps:$4 sm:$0xff]  }
  0x45   :  { %733 = vmatprep.subr.bf16.mxu0 %v1497_v42  ;;  %687 = vmatpush1.bf16.msra.mxu1 %v1574_v60  ;;  %v1593_v42 = vld [vmem:[#allocation2 + $0x2d0] ss:$8 sps:$4 sm:$0xff]  }
  0x46   :  { %688 = vmatprep.subr.bf16.mxu1 %v1578_v61 }
  0x48   :  { %734 = vmatpush1.bf16.msra.mxu0 %v1499_v45  ;;  %v1607_v45 = vld [vmem:[#allocation2 + $0x2f4] ss:$8 sps:$4 sm:$0xff]  }
  0x49   :  { %735 = vmatprep.subr.bf16.mxu0 %v1500_v46  ;;  %689 = vmatpush1.bf16.msra.mxu1 %v1580_v0  ;;  %v1605_v46 = vld [vmem:[#allocation2 + $0x2f0] ss:$8 sps:$4 sm:$0xff]  }
  0x4a   :  { %690 = vmatprep.subr.bf16.mxu1 %v1584_v3 }
  0x4c   :  { %736 = vmatpush1.bf16.msra.mxu0 %v1502_v49  ;;  %v1270_v49 = vld [vmem:[%s1798_s3 + $0x28] sm:$0xff]  }
  0x4d   :  { %737 = vmatprep.subr.bf16.mxu0 %v1506_v50  ;;  %691 = vmatpush1.bf16.msra.mxu1 %v1586_v5  ;;  %v1279_v50 = vld [vmem:[%s1798_s3 + $0x70] sm:$0xff]  }
  0x4e   :  { %692 = vmatprep.subr.bf16.mxu1 %v1590_v7 }
  0x50   :  { %738 = vmatpush1.bf16.msra.mxu0 %v1508_v53  ;;  %v1272_v53 = vld [vmem:[%s1798_s3 + $0x38] sm:$0xff]  }
  0x51   :  { %750 = vmatprep.subr.bf16.mxu0 %v1517_v54  ;;  %693 = vmatpush1.bf16.msra.mxu1 %v1592_v9  ;;  %v1235_v54 = vld [vmem:[%s1800_s5] sm:$0xff]  }
  0x52   :  { %694 = vmatprep.subr.bf16.mxu1 %v1596_v11 }
  0x53   :  { %740 = vmatmul.mubr.bf16.vlgmr.msra.gmra.mrb[0].mxu0 %v1512_v57 }
  0x54   :  { %751 = vmatpush1.bf16.msra.mxu0 %v1515_v58  ;;  %782 = vmatprep.mubr.bf16.mxu0 %v1610_v1 }
  0x55   :  { %752 = vmatprep.subr.bf16.mxu0 %v1523_v59  ;;  %695 = vmatpush1.bf16.msra.mxu1 %v1598_v13  ;;  %v144_v59 = vlaneseq }
  0x56   :  { %1380 = vmatprep.subr.bf16.mxu1 %v1273_v15 }
  0x57   :  { %v145_v60 = vshrl.u32 %v144_v59, 7 }
  0x58   :  { %753 = vmatpush1.bf16.msra.mxu0 %v1521_v63  ;;  %697 = vmatmul.mubr.bf16.vlgmr.msra.gmra.mrb[0].mxu1 %v1602_v16 }
  0x59   :  { %754 = vmatprep.subr.bf16.mxu0 %v1529_v2  ;;  %1382 = vmatpush3.bf16.msra.mxu1 %v1171_v19  ;;  %v146_v61 = vsub.s32 0, %v145_v60  ;;  %v150_v63 = vsub.s32 1, %v145_v60  ;;  %v1282_v19 = vld [vmem:[%s1800_s5 + $0x10] sm:$0xff]  }
  0x5a   :  { %1384 = vmatprep.subr.bf16.mxu1 %v1274_v20  ;;  %v1283_v20 = vld [vmem:[%s1800_s5 + $0x18] sm:$0xff]  }
  0x5b   :  { %v147_v0 = vrot.slane %v142_v62, %v146_v61  ;;  %v151_v1 = vrot.slane %v142_v62, %v150_v63 }
  0x5c   :  { %755 = vmatpush1.bf16.msra.mxu0 %v1527_v4 }
  0x5d   :  { %756 = vmatprep.subr.bf16.mxu0 %v1535_v6  ;;  %1386 = vmatpush3.bf16.msra.mxu1 %v1266_v23  ;;  %v1286_v23 = vld [vmem:[%s1800_s5 + $0x30] sm:$0xff]  }
  0x5e   :  { %1388 = vmatprep.subr.bf16.mxu1 %v1275_v24  ;;  %v1287_v24 = vld [vmem:[%s1800_s5 + $0x38] sm:$0xff]  }
  0x60   :  { %757 = vmatpush1.bf16.msra.mxu0 %v1533_v8 }
  0x61   :  { %758 = vmatprep.subr.bf16.mxu0 %v1541_v10  ;;  %1390 = vmatpush3.bf16.msra.mxu1 %v1267_v27 }
  0x62   :  { %1392 = vmatprep.subr.bf16.mxu1 %v1276_v28 }
  0x64   :  { %759 = vmatpush1.bf16.msra.mxu0 %v1539_v12 }
  0x65   :  { %760 = vmatprep.subr.bf16.mxu0 %v1547_v14  ;;  %1394 = vmatpush3.bf16.msra.mxu1 %v1268_v31 }
  0x66   :  { %1396 = vmatprep.subr.bf16.mxu1 %v1277_v32 }
  0x68   :  { %761 = vmatpush1.bf16.msra.mxu0 %v1545_v17  ;;  %v1281_v17 = vld [vmem:[%s1800_s5 + $0x8] sm:$0xff]  }
  0x69   :  { %762 = vmatprep.subr.bf16.mxu0 %v1553_v18  ;;  %1398 = vmatpush3.bf16.msra.mxu1 %v1269_v35 }
  0x6a   :  { %1400 = vmatprep.subr.bf16.mxu1 %v1278_v48 }
  0x6c   :  { %763 = vmatpush1.bf16.msra.mxu0 %v1551_v21  ;;  %v1284_v21 = vld [vmem:[%s1800_s5 + $0x20] sm:$0xff]  }
  0x6d   :  { %764 = vmatprep.subr.bf16.mxu0 %v1559_v22  ;;  %1402 = vmatpush3.bf16.msra.mxu1 %v1270_v49  ;;  %v1285_v22 = vld [vmem:[%s1800_s5 + $0x28] sm:$0xff]  }
  0x6e   :  { %1404 = vmatprep.subr.bf16.mxu1 %v1279_v50 }
  0x70   :  { %765 = vmatpush1.bf16.msra.mxu0 %v1557_v25 }
  0x71   :  { %766 = vmatprep.subr.bf16.mxu0 %v1565_v26  ;;  %1406 = vmatpush3.bf16.msra.mxu1 %v1271_v51  ;;  %v1168_v26 = vld [vmem:[%s1799_s4] ss:$0 sm:$0xff] }
  0x72   :  { %1408 = vmatprep.subr.bf16.mxu1 %v1280_v52 }
  0x74   :  { %767 = vmatpush1.bf16.msra.mxu0 %v1563_v29 }
  0x75   :  { %768 = vmatprep.subr.bf16.mxu0 %v1571_v30  ;;  %1410 = vmatpush3.bf16.msra.mxu1 %v1272_v53 }
  0x76   :  { %1412 = vmatprep.subr.bf16.mxu1 %v1235_v54 }
  0x78   :  { %769 = vmatpush1.bf16.msra.mxu0 %v1569_v33 }
  0x79   :  { %770 = vmatprep.subr.bf16.mxu0 %v1577_v34 }
  0x7c   :  { %771 = vmatpush1.bf16.msra.mxu0 %v1575_v36  ;;  %v1169_v36 = vld [vmem:[%s1801_s6] ss:$0 sm:$0xff] }
  0x7d   :  { %772 = vmatprep.subr.bf16.mxu0 %v1583_v37 }
  0x80   :  { %773 = vmatpush1.bf16.msra.mxu0 %v1581_v38 }
  0x81   :  { %774 = vmatprep.subr.bf16.mxu0 %v1589_v39 }
  0x84   :  { %775 = vmatpush1.bf16.msra.mxu0 %v1587_v40 }
  0x85   :  { %776 = vmatprep.subr.bf16.mxu0 %v1595_v41 }
  0x88   :  { %777 = vmatpush1.bf16.msra.mxu0 %v1593_v42 }
  0x89   :  { %778 = vmatprep.subr.bf16.mxu0 %v1601_v43 }
  0x8c   :  { %779 = vmatpush1.bf16.msra.mxu0 %v1599_v44 }
  0x8d   :  { %780 = vmatprep.subr.bf16.mxu0 %v1607_v45 }
  0x90   :  { %781 = vmatpush1.bf16.msra.mxu0 %v1605_v46 }
  0x93   :  { %783 = vmatmul.mubr.bf16.vlgmr.msra.gmra.mrb[0].mxu0 %v1608_v47 }
 0x12b   :  { %v698_v55 = vpop.f32.mrb[0].mxu1 }
 0x12c   :  { %v700_v56 = vpop.f32.mrb[1].mxu1  ;;  %v699_v2 = vadd.f32 %v698_v55, %v147_v0 }
 0x12d   :  { %v702_v57 = vpop.f32.mrb[2].mxu1  ;;  %v701_v3 = vadd.f32 %v700_v56, %v151_v1 }
 0x12e   :  { %v704_v58 = vpop.f32.mrb[3].mxu1  ;;  %v703_v5 = vadd.f32 %v702_v57, %v147_v0 }
 0x12f   :  { %v705_v8 = vadd.f32 %v704_v58, %v151_v1 }
 0x166   :  { %v784_v4 = vpop.f32.mrb[0].mxu0 }
 0x167   :  { %v1444_v6 = vadd.f32 %v784_v4, %v699_v2  ;;  %v786_v7 = vpop.f32.mrb[1].mxu0 }
 0x168   :  { %v1446_v9 = vadd.f32 %v786_v7, %v701_v3  ;;  %v788_v10 = vpop.f32.mrb[2].mxu0 }
 0x169   :  { %v1448_v11 = vadd.f32 %v788_v10, %v703_v5  ;;  %v790_v12 = vpop.f32.mrb[3].mxu0  ;;  %v793_v15 = vmax.f32 %v1444_v6, 0.0 }
 0x16a   :  { %v794_v13 = vmax.f32 %v1446_v9, 0.0  ;;  %v1450_v14 = vadd.f32 %v790_v12, %v705_v8 }
 0x16b   :  { %v795_v18 = vmax.f32 %v1448_v11, 0.0 }
 0x16c   :  { %v796_v16 = vmax.f32 %v1450_v14, 0.0  ;;  %932 = vmatprep.mubr.f32.mxu1 %v794_v13 }
 0x16d   :  { %933 = vmatmul.mubr.f32.vlgmr.msra.gmra.mrb[4].mxu1 %v793_v15 }
 0x16e   :  { %937 = vmatprep.mubr.f32.mxu1 %v796_v16  ;;  %1414 = vmatpush3.bf16.msra.mxu1 %v1235_v54 }
 0x16f   :  { %1416 = vmatprep.subr.bf16.mxu1 %v1281_v17 }
 0x171   :  { %938 = vmatmul.mubr.f32.gmra.mrb[6].mxu1 %v795_v18 }
 0x172   :  { %1418 = vmatpush3.bf16.msra.mxu1 %v1281_v17 }
 0x173   :  { %1420 = vmatprep.subr.bf16.mxu1 %v1282_v19 }
 0x176   :  { %1422 = vmatpush3.bf16.msra.mxu1 %v1282_v19 }
 0x177   :  { %1424 = vmatprep.subr.bf16.mxu1 %v1283_v20 }
 0x17a   :  { %1426 = vmatpush3.bf16.msra.mxu1 %v1283_v20 }
 0x17b   :  { %1428 = vmatprep.subr.bf16.mxu1 %v1284_v21 }
 0x17e   :  { %1430 = vmatpush3.bf16.msra.mxu1 %v1284_v21 }
 0x17f   :  { %1432 = vmatprep.subr.bf16.mxu1 %v1285_v22 }
 0x182   :  { %1434 = vmatpush3.bf16.msra.mxu1 %v1285_v22 }
 0x183   :  { %1436 = vmatprep.subr.bf16.mxu1 %v1286_v23 }
 0x186   :  { %1438 = vmatpush3.bf16.msra.mxu1 %v1286_v23 }
 0x187   :  { %1440 = vmatprep.subr.bf16.mxu1 %v1287_v24 }
 0x18a   :  { %1442 = vmatpush3.bf16.msra.mxu1 %v1287_v24 }
 0x240   :  { %v1320_v25 = vpop.f32.mrb[4].mxu1 }
 0x241   :  { %v1321_v27 = vpop.f32.mrb[5].mxu1 }
 0x242   :  { %v1322_v28 = vadd.f32 %v1321_v27, %v1320_v25 }
 0x244   :  { %v935_v29 = vadd.f32 %v1322_v28, %v1168_v26  ;;  %v1323_v30 = vpop.f32.mrb[6].mxu1 }
 0x245   :  { %v1324_v31 = vpop.f32.mrb[7].mxu1 }
 0x246   :  { %v943_v32 = vmax.f32 %v935_v29, 0.0  ;;  %v1325_v33 = vadd.f32 %v1324_v31, %v1323_v30 }
 0x248   :  { %v940_v34 = vadd.f32 %v1325_v33, %v1168_v26  ;;  %1376 = vmatprep.mubr.f32.mxu1 %v943_v32 }
 0x24a   :  { %v944_v35 = vmax.f32 %v940_v34, 0.0 }
 0x24c   :  { %1377 = vmatmul.mubr.f32.vlgmr.msra.gmra.mrb[8].mxu1 %v944_v35 }
 0x31f   :  { %v1378_v37 = vpop.f32.mrb[8].mxu1 }
 0x320   :  { %v1056_v38 = vadd.f32 %v1378_v37, %v1169_v36  ;;  %v1050_v39 = vpop.f32.mrb[9].mxu1 }
 0x321   :  { %v1051_v40 = vadd.f32 %v1169_v36, %v1050_v39 }
 0x322   :  { %1060 = vst [vmem:[%s1802_s7 + $0x8] sm:$0xff] %v1056_v38 }
 0x323   :  { %1059 = vst [vmem:[%s1802_s7] sm:$0xff] %v1051_v40 }
 0x324   :  { %1065 = vsyncpa [#allocation3], 1 }

</bundles_post_ra>
